<compile_context>
chip_gen: v6e
topology: v6e:2x2x1
jax: 0.10.0
libtpu: 0.0.40
codegen_flags: <defaults>
</compile_context>

<pallas_src>
import math

import jax
import jax.numpy as jnp
from jax.experimental import pallas as pl
from jax.experimental.pallas import tpu as pltpu


def _pick_tiles(B, T_eff, F_eff, elem, target_bytes):
    """Choose (batch_tile, time_tile) for a (B, T_eff, F_eff) streamed sum."""
    row_bytes = max(1, F_eff * elem)

    # Batch tile: a multiple of 8 (partial last block is handled by Pallas'
    # masked output store) or the full batch.  For B >= 16 keep at least two
    # batch blocks so v7x's second TensorCore has its own work.
    if B >= 16:
        bb_cap = max(8, (B // 2) // 8 * 8)
    else:
        bb_cap = B
    bb = 8 if bb_cap >= 8 else bb_cap

    # Time tile: a multiple of 8 (ragged tail masked in-kernel) or full T_eff.
    if T_eff <= 8:
        tt = T_eff
    else:
        fit = target_bytes // (bb * row_bytes)
        if fit >= T_eff:
            tt = T_eff
        else:
            tt = max(8, (fit // 8) * 8)

    # Whole time axis already fits in one block: spend the rest of the budget
    # on more batch rows per block.
    if tt == T_eff and bb < bb_cap:
        fit_b = target_bytes // (tt * row_bytes)
        if fit_b >= bb_cap:
            bb = bb_cap
        elif fit_b >= 8:
            bb = min(bb_cap, (fit_b // 8) * 8)
    return bb, tt


def _make_tap_kernel(t_eff, tt, steps_per_split, needs_mask):
    """Sum-over-time kernel.  x block: (Bb, Tt, F_eff); out block: (Bb, F_eff) f32."""

    def kernel(x_ref, o_ref):
        t = pl.program_id(2)

        @pl.when(t == 0)
        def _init():
            o_ref[...] = jnp.zeros_like(o_ref)

        x = x_ref[...]                                     # (Bb, Tt, F_eff)
        if needs_mask:
            # Unclamped global time-block index; duplicated (clamped) blocks
            # and the ragged tail get their invalid rows zeroed before summing.
            g = pl.program_id(1) * steps_per_split + t
            valid = t_eff - g * tt                          # rows in-bounds (may be <= 0)
            row = jax.lax.broadcasted_iota(jnp.int32, (1, tt, 1), 1)
            x = jnp.where(row < valid, x, jnp.zeros_like(x))

        # f32 accumulation without materialising an explicit full-block f32 temp.
        o_ref[...] += jnp.sum(x, axis=1, dtype=jnp.float32)

    return kernel


def temporal_attention_pooling(x, conv_weight=None, conv_bias=None, mask=None, *,
                               target_block_bytes=8 * 1024 * 1024,
                               min_kernel_bytes=2 * 1024 * 1024):
    """Forward of TemporalAttentionPooling.

    x: (B, T, F).  conv_weight (1, F, 1) / conv_bias (1,) / mask are accepted
    for interface parity but cannot affect the output: Softmax over the
    size-1 Conv1d out-channel axis is identically 1, so the forward reduces
    exactly to x.sum(axis=1, keepdims=True).
    """
    del conv_weight, conv_bias, mask   # mathematically irrelevant to the output
    B, T, F = x.shape
    out_dtype = x.dtype
    elem = x.dtype.itemsize

    # Tiny inputs: the fixed pallas_call / grid overhead dwarfs the traffic.
    if B * T * F * elem < min_kernel_bytes:
        return jnp.sum(x, axis=1, keepdims=True)

    # ---- lane packing: make the streamed last dim a multiple of 128 --------
    # (B, T, F) -> (B, T/k, k*F) is a contiguous minor-dim merge (free) and
    # makes every vreg / store lane-dense when F < 128 or F % 128 != 0.
    k = 1
    if F % 128 != 0:
        kk = 128 // math.gcd(F, 128)
        if kk > 1 and T % kk == 0:
            k = kk
    T_eff, F_eff = T // k, F * k
    x_k = x.reshape(B, T_eff, F_eff) if k > 1 else x

    # ---- block sizing -------------------------------------------------------
    bb, tt = _pick_tiles(B, T_eff, F_eff, elem, target_block_bytes)
    grid_b = pl.cdiv(B, bb)
    grid_t_total = pl.cdiv(T_eff, tt)

    # v7x megacore needs >= 2 "parallel" work items.  If there is only one
    # batch block, split the time reduction into two independent partial
    # slabs (folded in the wrapper).
    n_split = 2 if (grid_b == 1 and grid_t_total >= 2) else 1
    steps_per_split = pl.cdiv(grid_t_total, n_split)
    needs_mask = (n_split * steps_per_split * tt != T_eff)
    last_t_block = grid_t_total - 1

    # TODO(synk): add an F-tiling ("parallel") grid axis for F_eff so large
    # that even a minimal (8, 8, F_eff) block blows the VMEM budget.

    in_block_bytes = bb * tt * F_eff * elem
    out_block_bytes = bb * F_eff * 4
    needed = 2 * in_block_bytes + 2 * out_block_bytes + (2 << 20)
    if elem < 4:
        needed += bb * tt * F_eff * 4        # headroom for an f32 upcast temp
    vmem_limit = int(max(needed, 32 << 20))

    kernel = _make_tap_kernel(T_eff, tt, steps_per_split, needs_mask)

    partial = pl.pallas_call(
        kernel,
        out_shape=jax.ShapeDtypeStruct((n_split, B, F_eff), jnp.float32),
        grid=(grid_b, n_split, steps_per_split),
        in_specs=[pl.BlockSpec(
            (bb, tt, F_eff),
            lambda b, s, t: (b,
                             jnp.minimum(s * steps_per_split + t, last_t_block),
                             0))],
        out_specs=pl.BlockSpec((None, bb, F_eff), lambda b, s, t: (s, b, 0)),
        compiler_params=pltpu.CompilerParams(
            dimension_semantics=("parallel", "parallel", "arbitrary"),
            vmem_limit_bytes=vmem_limit),
    )(x_k)

    res = partial.sum(axis=0)                      # fold the time splits (tiny)
    if k > 1:
        res = res.reshape(B, k, F).sum(axis=1)     # fold lane packing (tiny)
    return res.astype(out_dtype).reshape(B, 1, F)


def _reference_forward(x, conv_weight, conv_bias):
    """Literal pure-JAX re-implementation of the PyTorch forward (f32)."""
    xf = x.astype(jnp.float32)
    x_a = jnp.transpose(xf, (0, 2, 1))                               # (B, F, T)
    s = jnp.einsum("bft,of->bot", x_a, conv_weight[:, :, 0].astype(jnp.float32))
    s = s + conv_bias.astype(jnp.float32)[None, :, None]             # (B, 1, T)
    attn = jax.nn.softmax(s, axis=1)                                 # == 1 everywhere
    ref = jnp.sum(jnp.transpose(attn * x_a, (0, 2, 1)), axis=1, keepdims=True)
    return ref                                                       # (B, 1, F) f32


if __name__ == "__main__":
    cases = [
        # (B, T, F, dtype, wrapper kwargs, atol, rtol)
        (2, 8, 32, jnp.float32, dict(), 1e-5, 1e-5),                    # tiny-input fallback
        (2, 8, 32, jnp.float32, dict(min_kernel_bytes=0), 1e-5, 1e-5),  # kernel, single block
        (3, 1080, 48, jnp.float32,                                      # split + ragged mask + clamp
         dict(min_kernel_bytes=0, target_block_bytes=4096), 1e-4, 1e-5),
        (20, 64, 32, jnp.float32,                                       # partial batch block
         dict(min_kernel_bytes=0, target_block_bytes=4096), 1e-4, 1e-5),
        (8, 2048, 96, jnp.float32, dict(), 1e-4, 1e-5),                 # natural kernel path
        (4, 512, 64, jnp.bfloat16,                                      # bf16, time split
         dict(min_kernel_bytes=0, target_block_bytes=4096), 2e-1, 2e-2),
    ]

    root = jax.random.PRNGKey(0)
    for i, (B, T, F, dtype, kwargs, atol, rtol) in enumerate(cases):
        kx, kw, kb = jax.random.split(jax.random.fold_in(root, i), 3)
        x = jax.random.normal(kx, (B, T, F), dtype=jnp.float32)

        # Deterministic small-uniform init for Conv1d(F -> 1, kernel_size=1).
        bound = 1.0 / F
        conv_weight = jax.random.uniform(kw, (1, F, 1), minval=-bound, maxval=bound,
                                         dtype=jnp.float32)
        conv_bias = jax.random.uniform(kb, (1,), minval=-bound, maxval=bound,
                                       dtype=jnp.float32)

        x = x.astype(dtype)
        out = temporal_attention_pooling(x, conv_weight, conv_bias, **kwargs)
        out = jax.block_until_ready(out)

        assert out.shape == (B, 1, F), (i, out.shape)
        assert out.dtype == x.dtype, (i, out.dtype)

        ref = _reference_forward(x, conv_weight, conv_bias)
        assert jnp.allclose(out.astype(jnp.float32), ref, atol=atol, rtol=rtol), \
            f"case {i}: max abs err {jnp.max(jnp.abs(out.astype(jnp.float32) - ref))}"

    print("KERNEL_OK")
</pallas_src>

<mosaic_0001>
module attributes {stable_mosaic.version = 11 : i64} {
  func.func @kernel(%arg0: i32, %arg1: i32, %arg2: i32, %arg3: memref<2x2x128xf32, #tpu.memory_space<vmem>>, %arg4: memref<1x2x128xf32, #tpu.memory_space<vmem>>) attributes {dimension_semantics = [#tpu.dimension_semantics<parallel>, #tpu.dimension_semantics<parallel>, #tpu.dimension_semantics<arbitrary>], iteration_bounds = array<i64: 1, 1, 1>, scalar_prefetch = 0 : i64, scratch_operands = 0 : i64, tpu.core_type = #tpu.core_type<tc>, window_params = [{transform_indices = @transform_0, window_bounds = array<i64: 2, 2, 128>}, {transform_indices = @transform_1, window_bounds = array<i64: 1, 2, 128>}]} {
    %c0_i32 = arith.constant 0 : i32
    %0 = arith.cmpi eq, %arg2, %c0_i32 : i32
    %1 = arith.extui %0 : i1 to i32
    %c0_i32_0 = arith.constant 0 : i32
    %2 = arith.cmpi ne, %1, %c0_i32_0 : i32
    scf.if %2 {
      %cst_9 = arith.constant 0.000000e+00 : f32
      %11 = vector.broadcast %cst_9 : f32 to vector<2x128xf32>
      %c0_10 = arith.constant 0 : index
      %c0_11 = arith.constant 0 : index
      %c0_12 = arith.constant 0 : index
      %12 = vector.load %arg4[%c0_10, %c0_11, %c0_12] : memref<1x2x128xf32, #tpu.memory_space<vmem>>, vector<1x2x128xf32>
      %13 = vector.shape_cast %12 : vector<1x2x128xf32> to vector<2x128xf32>
      %14 = vector.shape_cast %11 : vector<2x128xf32> to vector<1x2x128xf32>
      tpu.vector_store %arg4[%c0_10, %c0_11, %c0_12], %14 {strides = array<i32>} : memref<1x2x128xf32, #tpu.memory_space<vmem>>, vector<1x2x128xf32>,
    } else {
    }
    %c0 = arith.constant 0 : index
    %c0_1 = arith.constant 0 : index
    %c0_2 = arith.constant 0 : index
    %3 = vector.load %arg3[%c0, %c0_1, %c0_2] : memref<2x2x128xf32, #tpu.memory_space<vmem>>, vector<2x2x128xf32>
    %c0_3 = arith.constant 0 : index
    %c0_4 = arith.constant 0 : index
    %c0_5 = arith.constant 0 : index
    %4 = vector.load %arg4[%c0_3, %c0_4, %c0_5] : memref<1x2x128xf32, #tpu.memory_space<vmem>>, vector<1x2x128xf32>
    %5 = vector.shape_cast %4 : vector<1x2x128xf32> to vector<2x128xf32>
    %cst = arith.constant dense<0.000000e+00> : vector<2x128xf32>
    %6 = vector.multi_reduction <add>, %3, %cst [1] : vector<2x2x128xf32> to vector<2x128xf32>
    %7 = arith.addf %5, %6 : vector<2x128xf32>
    %c0_6 = arith.constant 0 : index
    %c0_7 = arith.constant 0 : index
    %c0_8 = arith.constant 0 : index
    %8 = vector.load %arg4[%c0_6, %c0_7, %c0_8] : memref<1x2x128xf32, #tpu.memory_space<vmem>>, vector<1x2x128xf32>
    %9 = vector.shape_cast %8 : vector<1x2x128xf32> to vector<2x128xf32>
    %10 = vector.shape_cast %7 : vector<2x128xf32> to vector<1x2x128xf32>
    tpu.vector_store %arg4[%c0_6, %c0_7, %c0_8], %10 {strides = array<i32>} : memref<1x2x128xf32, #tpu.memory_space<vmem>>, vector<1x2x128xf32>,
    return
  }
  func.func @transform_0(%arg0: i32, %arg1: i32, %arg2: i32) -> (i32, i32, i32) {
    %c1_i32 = arith.constant 1 : i32
    %0 = arith.muli %arg1, %c1_i32 : i32
    %1 = arith.addi %0, %arg2 : i32
    %c0_i32 = arith.constant 0 : i32
    %2 = arith.minsi %1, %c0_i32 : i32
    %c0_i32_0 = arith.constant 0 : i32
    %c0_i32_1 = arith.constant 0 : i32
    return %arg0, %2, %c0_i32_0 : i32, i32, i32
  }
  func.func @transform_1(%arg0: i32, %arg1: i32, %arg2: i32) -> (i32, i32, i32) {
    %c0_i32 = arith.constant 0 : i32
    %c0_i32_0 = arith.constant 0 : i32
    return %arg1, %arg0, %c0_i32 : i32, i32, i32
  }
}

</mosaic_0001>

<bundles_post_ra>
// kernel: tpu_custom_call.1
= control target key start
LH: loop header
LB: loop body
LE: loop exit
PB: predicated region body
PF: predicated region fallthrough
CT: control target
= control target key end

     0   :  { %6 = vsyncpa [#allocation3], 0  ;;  %s148_s0 = inlined_call_operand.hbm [shape: f32[2,2,128], index: 0, kind: input, shape index: {}]   ;;  %s149_s1 = inlined_call_operand.hbm [shape: f32[1,2,128], index: 1, kind: output, shape index: {}]  }
   0x1   :  { %7 = vsyncpa [#allocation4], 0  ;;  %s127_s6 = smov [#allocation2]  }
   0x2   :  { %s18_s7 = sshll.u32 %s127_s6, 4  ;;  %s19_s7 = int_to_ptr.vmem [resolvable:$true] %s18_s7 }
   0x3   :  { %s91_s8 = scalar_lea.vmem %s19_s7, 64  ;;  %p96_p1 = scmp.lt.s32.totalorder %s19_s7, %s19_s7 }
   0x4   :  { %p92_p0 = scmp.ne.s32.totalorder %s19_s7, %s91_s8  ;;  %p97_p2 = scmp.lt.s32.totalorder %s91_s8, %s91_s8 }
   0x6   :  { %p98_p3 = por %p97_p2, %p96_p1 }
   0x8   :  { %p99_p4 = pnand %p98_p3, %p92_p0 }
   0xa   :  { %102 = shalt.err (!%p99_p4)
}
   0xb   :  { %s128_s9 = smov 32   ;;  %s129_s10 = smov 2  }
   0xc   :  { %24 = dma.hbm_to_vmem [thread:$0]  %s148_s0, 64, %s19_s7, [#allocation3], %s128_s9, %s128_s9, %s129_s10  }
   0xd   :  { %123 = dma.done.wait [#allocation3], 64  }
   0xe   :  { %124 = vsyncadd [#allocation3], 4294967232  ;;  %v130_v0 = vmov 0.0   ;;  %vm39_vm0 = vcmask 1041408   ;;  %v36_v1 = vld [vmem:[#allocation2] sm:$0x3] }
   0xf   :  { %35 = vst [vmem:[#allocation5] sm:$0x3] %v130_v0  ;;  %v37_v2 = vld [vmem:[#allocation2 + $0x2] sm:$0x3]  ;;  %v40_v3 = vsel %vm39_vm0, %v36_v1, 0.0  ;;  %vm56_vm1 = vcmask 1041409  }
  0x10   :  { %v47_v4 = vsel %vm39_vm0, %v37_v2, 0.0  ;;  %v41_v5 = vrot.slane %v40_v3, 4  ;;  %s131_s0 = smov [#allocation5]  }
  0x11   :  { %v48_v6 = vrot.slane %v47_v4, 4  ;;  %s67_s13 = sshll.u32 %s131_s0, 4  ;;  %s68_s13 = int_to_ptr.vmem [resolvable:$true] %s67_s13 }
  0x12   :  { %v42_v7 = vadd.f32 %v41_v5, %v40_v3  ;;  %s103_s14 = scalar_lea.vmem %s68_s13, 32  ;;  %p108_p6 = scmp.lt.s32.totalorder %s68_s13, %s68_s13 }
  0x13   :  { %v49_v8 = vadd.f32 %v48_v6, %v47_v4  ;;  %p104_p5 = scmp.ne.s32.totalorder %s68_s13, %s103_s14  ;;  %p109_p7 = scmp.lt.s32.totalorder %s103_s14, %s103_s14 }
  0x14   :  { %v43_v9 = vrot.slane %v42_v7, 2 }
  0x15   :  { %v50_v10 = vrot.slane %v49_v8, 2  ;;  %p110_p8 = por %p109_p7, %p108_p6 }
  0x16   :  { %v44_v11 = vadd.f32 %v43_v9, %v42_v7  ;;  %v38_v15 = vld [vmem:[#allocation5] sm:$0x3] }
  0x17   :  { %v51_v12 = vadd.f32 %v50_v10, %v49_v8  ;;  %p111_p9 = pnand %p110_p8, %p104_p5 }
  0x18   :  { %v45_v13 = vrot.slane %v44_v11, 1 }
  0x19   :  { %v52_v14 = vrot.slane %v51_v12, 1 }
  0x1a   :  { %v46_v16 = vadd.f32 %v45_v13, %v44_v11 }
  0x1b   :  { %v53_v17 = vadd.f32 %v52_v14, %v51_v12 }
  0x1d   :  { %v57_v18 = vsel %vm56_vm1, %v53_v17, %v46_v16 }
  0x1e   :  { %v59_v19 = vadd.f32 %v57_v18, %v38_v15 }
  0x20   :  { %60 = vst [vmem:[#allocation5] sm:$0x3] %v59_v19 }
  0x21   :  { %114 = shalt.err (!%p111_p9)
}
  0x22   :  { %70 = dma.vmem_to_hbm [thread:$0]  %s68_s13, 32, %s149_s1, [#allocation4]  }
  0x23   :  { %125 = dma.done.wait [#allocation4], 32  }
  0x24   :  { %126 = vsyncadd [#allocation4], 4294967264 }
  0x25   :  { %74 = vsyncpa [#allocation3], 1 }
  0x26   :  { %75 = vsyncpa [#allocation4], 1 }

</bundles_post_ra>
